<compile_context>
chip_gen: v7x
topology: tpu7x:2x2x1
jax: 0.10.0
libtpu: 0.0.40
codegen_flags: <defaults>
</compile_context>

<pallas_src>
import functools

import jax
import jax.numpy as jnp
from jax.experimental import pallas as pl
from jax.experimental.pallas import tpu as pltpu


def _round_up(x, m):
    return ((x + m - 1) // m) * m


# ----------------------------- Pallas kernel -------------------------------

def _mlp_kernel(*refs, num_layers):
    """refs layout: x_ref, (w_ref, b_ref) * (num_layers + 1), o_ref.

    Computes out = (relu(...relu(x @ W0 + b0)... @ W_{L-1} + b_{L-1})) @ Wout + bout
    entirely in VMEM/vregs: activations never leave the chip between layers.
    Weights are bf16, accumulation is f32 on the MXU, hidden activations are
    re-cast to bf16 between layers."""
    x_ref = refs[0]
    o_ref = refs[-1]

    h = x_ref[...].astype(jnp.bfloat16)
    for li in range(num_layers):
        w = refs[1 + 2 * li][...]
        b = refs[2 + 2 * li][...]
        acc = jnp.dot(h, w, preferred_element_type=jnp.float32) + b
        h = jnp.maximum(acc, 0.0).astype(jnp.bfloat16)

    w = refs[1 + 2 * num_layers][...]
    b = refs[2 + 2 * num_layers][...]
    o_ref[...] = jnp.dot(h, w, preferred_element_type=jnp.float32) + b


# ----------------------------- fused wrapper --------------------------------

def fused_mlp_padded(xp, weights, biases, tm):
    """xp: [Mp, Ap] f32 (row/lane padded) activations.
    weights: list of [Kp_i, Np_i] bf16 padded weights (last one is the output layer).
    biases:  list of [1, Np_i] f32 padded biases.
    Returns [Mp, Np_last] f32."""
    Mp, Ap = xp.shape
    num_layers = len(weights) - 1
    Np_out = weights[-1].shape[1]
    assert Mp % tm == 0

    in_specs = [pl.BlockSpec((tm, Ap), lambda i: (i, 0))]
    flat_params = []
    for w, b in zip(weights, biases):
        in_specs.append(pl.BlockSpec(w.shape, lambda i: (0, 0)))
        in_specs.append(pl.BlockSpec(b.shape, lambda i: (0, 0)))
        flat_params.extend([w, b])

    # Explicit VMEM budget: params (held once) + double-buffered x/out tiles
    # + generous headroom for intermediate activations / spills.
    param_bytes = sum(int(a.size) * a.dtype.itemsize for a in flat_params)
    tile_bytes = 2 * (tm * Ap * 4 + tm * Np_out * 4)
    vmem_limit = min(max(2 * param_bytes + tile_bytes + (8 << 20), 16 << 20),
                     60 << 20)

    return pl.pallas_call(
        functools.partial(_mlp_kernel, num_layers=num_layers),
        out_shape=jax.ShapeDtypeStruct((Mp, Np_out), jnp.float32),
        grid_spec=pltpu.PrefetchScalarGridSpec(
            num_scalar_prefetch=0,
            grid=(Mp // tm,),
            in_specs=in_specs,
            out_specs=pl.BlockSpec((tm, Np_out), lambda i: (i, 0)),
        ),
        compiler_params=pltpu.CompilerParams(
            dimension_semantics=("parallel",),
            vmem_limit_bytes=vmem_limit),
    )(xp, *flat_params)


# --------------------------- parameters -------------------------------------

def init_params(key, action_size, output_size, hidden_size=256, num_layers=1):
    """Mirrors PyTorch nn.Linear default init: U(-1/sqrt(fan_in), +1/sqrt(fan_in))."""
    dims = [action_size] + [hidden_size] * num_layers
    keys = jax.random.split(key, 2 * (num_layers + 1))
    layers = []
    for li in range(num_layers):
        fan_in = dims[li]
        bound = 1.0 / (fan_in ** 0.5)
        w = jax.random.uniform(keys[2 * li], (fan_in, dims[li + 1]),
                               jnp.float32, -bound, bound)
        b = jax.random.uniform(keys[2 * li + 1], (dims[li + 1],),
                               jnp.float32, -bound, bound)
        layers.append((w, b))
    bound = 1.0 / (hidden_size ** 0.5)
    out_w = jax.random.uniform(keys[-2], (hidden_size, output_size),
                               jnp.float32, -bound, bound)
    out_b = jax.random.uniform(keys[-1], (output_size,),
                               jnp.float32, -bound, bound)
    return {'layers': layers, 'out_w': out_w, 'out_b': out_b}


def prepare_params(params):
    """Pad every weight/bias to lane multiples and cast weights to bf16, ONCE."""
    def pad_wb(w, b):
        K, N = w.shape
        Kp, Np = _round_up(K, 128), _round_up(N, 128)
        wp = jnp.zeros((Kp, Np), jnp.bfloat16).at[:K, :N].set(
            w.astype(jnp.bfloat16))
        bp = jnp.zeros((1, Np), jnp.float32).at[0, :N].set(b)
        return wp, bp

    weights, biases = [], []
    for (w, b) in params['layers']:
        wp, bp = pad_wb(w, b)
        weights.append(wp)
        biases.append(bp)
    wp, bp = pad_wb(params['out_w'], params['out_b'])
    weights.append(wp)
    biases.append(bp)

    return {
        'weights': weights,
        'biases': biases,
        'in_dim': params['layers'][0][0].shape[0],
        'out_dim': params['out_w'].shape[1],
    }


# --------------------------- model forward -----------------------------------

def action_network_forward(prepped, tensor):
    """tensor: [B, action_size] f32 -> [B, output_size] f32."""
    M, A = tensor.shape
    assert A == prepped['in_dim']
    # Pad batch rows to 8 (small M) or 128 (large M); pick tm accordingly.
    Mp = _round_up(M, 8) if M <= 128 else _round_up(M, 128)
    tm = Mp if Mp <= 256 else 128
    Ap = prepped['weights'][0].shape[0]
    xp = jnp.zeros((Mp, Ap), jnp.float32).at[:M, :A].set(tensor)

    out = fused_mlp_padded(xp, prepped['weights'], prepped['biases'], tm)
    return out[:M, :prepped['out_dim']]


def make_forward(prepped):
    return jax.jit(lambda x: action_network_forward(prepped, x))


# --------------------------- pure-JAX reference ------------------------------

def reference_forward(params, tensor):
    h = tensor
    for w, b in params['layers']:
        h = jnp.maximum(h @ w + b, 0.0)
    return h @ params['out_w'] + params['out_b']


if __name__ == "__main__":
    key = jax.random.PRNGKey(0)
    pkey, xkey = jax.random.split(key)

    batch, action_size, hidden_size, output_size, num_layers = 2, 8, 32, 4, 2
    params = init_params(pkey, action_size, output_size,
                         hidden_size=hidden_size, num_layers=num_layers)
    prepped = prepare_params(params)
    forward = make_forward(prepped)

    x = jax.random.normal(xkey, (batch, action_size), jnp.float32)

    out = forward(x)
    out = jax.block_until_ready(out)

    ref = reference_forward(params, x)
    assert out.shape == (batch, output_size)
    assert bool(jnp.all(jnp.isfinite(out)))
    assert bool(jnp.allclose(out, ref, rtol=2e-2, atol=2e-2)), (out, ref)
    print("KERNEL_OK")
</pallas_src>

<mosaic_0001>
module attributes {stable_mosaic.version = 11 : i64} {
  func.func @_mlp_kernel(%arg0: i32, %arg1: memref<8x128xf32, #tpu.memory_space<vmem>>, %arg2: memref<128x128xbf16, #tpu.memory_space<vmem>>, %arg3: memref<1x128xf32, #tpu.memory_space<vmem>>, %arg4: memref<128x128xbf16, #tpu.memory_space<vmem>>, %arg5: memref<1x128xf32, #tpu.memory_space<vmem>>, %arg6: memref<128x128xbf16, #tpu.memory_space<vmem>>, %arg7: memref<1x128xf32, #tpu.memory_space<vmem>>, %arg8: memref<8x128xf32, #tpu.memory_space<vmem>>) attributes {dimension_semantics = [#tpu.dimension_semantics<parallel>], iteration_bounds = array<i64: 1>, scalar_prefetch = 0 : i64, scratch_operands = 0 : i64, tpu.core_type = #tpu.core_type<tc>, window_params = [{transform_indices = @transform_0, window_bounds = array<i64: 8, 128>}, {pipeline_mode = #tpu.pipeline_mode<synchronous>, transform_indices = @transform_1, window_bounds = array<i64: 128, 128>}, {pipeline_mode = #tpu.pipeline_mode<synchronous>, transform_indices = @transform_2, window_bounds = array<i64: 1, 128>}, {pipeline_mode = #tpu.pipeline_mode<synchronous>, transform_indices = @transform_3, window_bounds = array<i64: 128, 128>}, {pipeline_mode = #tpu.pipeline_mode<synchronous>, transform_indices = @transform_4, window_bounds = array<i64: 1, 128>}, {pipeline_mode = #tpu.pipeline_mode<synchronous>, transform_indices = @transform_5, window_bounds = array<i64: 128, 128>}, {pipeline_mode = #tpu.pipeline_mode<synchronous>, transform_indices = @transform_6, window_bounds = array<i64: 1, 128>}, {transform_indices = @transform_7, window_bounds = array<i64: 8, 128>}]} {
    %c0 = arith.constant 0 : index
    %c0_0 = arith.constant 0 : index
    %0 = vector.load %arg1[%c0, %c0_0] : memref<8x128xf32, #tpu.memory_space<vmem>>, vector<8x128xf32>
    %1 = arith.truncf %0 : vector<8x128xf32> to vector<8x128xbf16>
    %c0_1 = arith.constant 0 : index
    %c0_2 = arith.constant 0 : index
    %2 = vector.load %arg2[%c0_1, %c0_2] : memref<128x128xbf16, #tpu.memory_space<vmem>>, vector<128x128xbf16>
    %c0_3 = arith.constant 0 : index
    %c0_4 = arith.constant 0 : index
    %3 = vector.load %arg3[%c0_3, %c0_4] : memref<1x128xf32, #tpu.memory_space<vmem>>, vector<1x128xf32>
    %cst = arith.constant dense<0.000000e+00> : vector<8x128xf32>
    %4 = tpu.matmul %1, %2, %cst {dimension_numbers = #tpu.dot_dimension_numbers<[1], [0], [0], [1], [0, 0, 1, 1], [], []>} : vector<8x128xbf16>, vector<128x128xbf16>, vector<8x128xf32> -> vector<8x128xf32>
    %5 = vector.broadcast %3 : vector<1x128xf32> to vector<8x128xf32>
    %6 = arith.addf %4, %5 : vector<8x128xf32>
    %cst_5 = arith.constant 0.000000e+00 : f32
    %7 = vector.broadcast %cst_5 : f32 to vector<8x128xf32>
    %8 = arith.maximumf %6, %7 : vector<8x128xf32>
    %9 = arith.truncf %8 : vector<8x128xf32> to vector<8x128xbf16>
    %c0_6 = arith.constant 0 : index
    %c0_7 = arith.constant 0 : index
    %10 = vector.load %arg4[%c0_6, %c0_7] : memref<128x128xbf16, #tpu.memory_space<vmem>>, vector<128x128xbf16>
    %c0_8 = arith.constant 0 : index
    %c0_9 = arith.constant 0 : index
    %11 = vector.load %arg5[%c0_8, %c0_9] : memref<1x128xf32, #tpu.memory_space<vmem>>, vector<1x128xf32>
    %cst_10 = arith.constant dense<0.000000e+00> : vector<8x128xf32>
    %12 = tpu.matmul %9, %10, %cst_10 {dimension_numbers = #tpu.dot_dimension_numbers<[1], [0], [0], [1], [0, 0, 1, 1], [], []>} : vector<8x128xbf16>, vector<128x128xbf16>, vector<8x128xf32> -> vector<8x128xf32>
    %13 = vector.broadcast %11 : vector<1x128xf32> to vector<8x128xf32>
    %14 = arith.addf %12, %13 : vector<8x128xf32>
    %cst_11 = arith.constant 0.000000e+00 : f32
    %15 = vector.broadcast %cst_11 : f32 to vector<8x128xf32>
    %16 = arith.maximumf %14, %15 : vector<8x128xf32>
    %17 = arith.truncf %16 : vector<8x128xf32> to vector<8x128xbf16>
    %c0_12 = arith.constant 0 : index
    %c0_13 = arith.constant 0 : index
    %18 = vector.load %arg6[%c0_12, %c0_13] : memref<128x128xbf16, #tpu.memory_space<vmem>>, vector<128x128xbf16>
    %c0_14 = arith.constant 0 : index
    %c0_15 = arith.constant 0 : index
    %19 = vector.load %arg7[%c0_14, %c0_15] : memref<1x128xf32, #tpu.memory_space<vmem>>, vector<1x128xf32>
    %cst_16 = arith.constant dense<0.000000e+00> : vector<8x128xf32>
    %20 = tpu.matmul %17, %18, %cst_16 {dimension_numbers = #tpu.dot_dimension_numbers<[1], [0], [0], [1], [0, 0, 1, 1], [], []>} : vector<8x128xbf16>, vector<128x128xbf16>, vector<8x128xf32> -> vector<8x128xf32>
    %21 = vector.broadcast %19 : vector<1x128xf32> to vector<8x128xf32>
    %22 = arith.addf %20, %21 : vector<8x128xf32>
    %c0_17 = arith.constant 0 : index
    %c0_18 = arith.constant 0 : index
    %23 = vector.load %arg8[%c0_17, %c0_18] : memref<8x128xf32, #tpu.memory_space<vmem>>, vector<8x128xf32>
    tpu.vector_store %arg8[%c0_17, %c0_18], %22 {strides = array<i32>} : memref<8x128xf32, #tpu.memory_space<vmem>>, vector<8x128xf32>,
    return
  }
  func.func @transform_0(%arg0: i32) -> (i32, i32) {
    %c0_i32 = arith.constant 0 : i32
    %c0_i32_0 = arith.constant 0 : i32
    return %arg0, %c0_i32 : i32, i32
  }
  func.func @transform_1(%arg0: i32) -> (i32, i32) {
    %c0_i32 = arith.constant 0 : i32
    %c0_i32_0 = arith.constant 0 : i32
    %c0_i32_1 = arith.constant 0 : i32
    return %c0_i32, %c0_i32_0 : i32, i32
  }
  func.func @transform_2(%arg0: i32) -> (i32, i32) {
    %c0_i32 = arith.constant 0 : i32
    %c0_i32_0 = arith.constant 0 : i32
    %c0_i32_1 = arith.constant 0 : i32
    return %c0_i32, %c0_i32_0 : i32, i32
  }
  func.func @transform_3(%arg0: i32) -> (i32, i32) {
    %c0_i32 = arith.constant 0 : i32
    %c0_i32_0 = arith.constant 0 : i32
    %c0_i32_1 = arith.constant 0 : i32
    return %c0_i32, %c0_i32_0 : i32, i32
  }
  func.func @transform_4(%arg0: i32) -> (i32, i32) {
    %c0_i32 = arith.constant 0 : i32
    %c0_i32_0 = arith.constant 0 : i32
    %c0_i32_1 = arith.constant 0 : i32
    return %c0_i32, %c0_i32_0 : i32, i32
  }
  func.func @transform_5(%arg0: i32) -> (i32, i32) {
    %c0_i32 = arith.constant 0 : i32
    %c0_i32_0 = arith.constant 0 : i32
    %c0_i32_1 = arith.constant 0 : i32
    return %c0_i32, %c0_i32_0 : i32, i32
  }
  func.func @transform_6(%arg0: i32) -> (i32, i32) {
    %c0_i32 = arith.constant 0 : i32
    %c0_i32_0 = arith.constant 0 : i32
    %c0_i32_1 = arith.constant 0 : i32
    return %c0_i32, %c0_i32_0 : i32, i32
  }
  func.func @transform_7(%arg0: i32) -> (i32, i32) {
    %c0_i32 = arith.constant 0 : i32
    %c0_i32_0 = arith.constant 0 : i32
    return %arg0, %c0_i32 : i32, i32
  }
}

</mosaic_0001>

<bundles_post_ra>
// kernel: _lambda_.1
= control target key start
LH: loop header
LB: loop body
LE: loop exit
PB: predicated region body
PF: predicated region fallthrough
CT: control target
= control target key end

     0   :  { %12 = vsyncpa [#allocation3], 0  ;;  %s773_s0 = inlined_call_operand.vmem [shape: f32[8,128], index: 0, kind: input, shape index: {}]   ;;  %s774_s1 = inlined_call_operand.hbm [shape: bf16[128,128], index: 1, kind: input, shape index: {}]   ;;  %s775_s2 = inlined_call_operand.vmem [shape: f32[1,128], index: 2, kind: input, shape index: {}]   ;;  %s776_s3 = inlined_call_operand.hbm [shape: bf16[128,128], index: 3, kind: input, shape index: {}]   ;;  %s777_s4 = inlined_call_operand.vmem [shape: f32[1,128], index: 4, kind: input, shape index: {}]   ;;  %s778_s5 = inlined_call_operand.hbm [shape: bf16[128,128], index: 5, kind: input, shape index: {}]   ;;  %s779_s6 = inlined_call_operand.vmem [shape: f32[1,128], index: 6, kind: input, shape index: {}]   ;;  %s780_s7 = inlined_call_operand.vmem [shape: f32[8,128], index: 7, kind: output, shape index: {}]  }
   0x1   :  { %13 = vsyncpa [#allocation5], 0  ;;  %s629_s24 = smov [#allocation4]   ;;  %s630_s26 = smov [#allocation2]  }
   0x2   :  { %s35_s25 = sshll.u32 %s629_s24, 4  ;;  %s21_s27 = sshll.u32 %s630_s26, 4  ;;  %s36_s25 = int_to_ptr.vmem [resolvable:$true] %s35_s25  ;;  %s676_s27 = int_to_ptr.vmem [resolvable:$true] %s21_s27 }
   0x3   :  { %s559_s30 = scalar_lea.hbm %s776_s3, 1024 }
   0x4   :  { %p560_p0 = scmp.ne.s32.totalorder %s776_s3, %s559_s30  ;;  %p563_p1 = scmp.lt.u32.totalorder %s559_s30, %s776_s3 }
   0x6   :  { %p565_p2 = pnand %p563_p1, %p560_p0 }
   0x8   :  { %568 = shalt.err (!%p565_p2)
}
   0x9   :  { %s569_s12 = scalar_lea.vmem %s36_s25, 1024  ;;  %p574_p4 = scmp.lt.s32.totalorder %s36_s25, %s36_s25 }
   0xa   :  { %p570_p3 = scmp.ne.s32.totalorder %s36_s25, %s569_s12  ;;  %p575_p5 = scmp.lt.s32.totalorder %s569_s12, %s569_s12 }
   0xc   :  { %p576_p6 = por %p575_p5, %p574_p4 }
   0xe   :  { %p577_p7 = pnand %p576_p6, %p570_p3 }
  0x10   :  { %580 = shalt.err (!%p577_p7)
}
  0x11   :  { %s631_s13 = smov 64   ;;  %s632_s14 = smov 4  }
  0x12   :  { %41 = dma.hbm_to_vmem [thread:$0]  %s776_s3, 1024, %s36_s25, [#allocation5], %s631_s13, %s631_s13, %s632_s14  }
  0x13   :  { %s581_s19 = scalar_lea.hbm %s774_s1, 1024 }
  0x14   :  { %p582_p8 = scmp.ne.s32.totalorder %s774_s1, %s581_s19  ;;  %p585_p9 = scmp.lt.u32.totalorder %s581_s19, %s774_s1 }
  0x16   :  { %p587_p10 = pnand %p585_p9, %p582_p8 }
  0x18   :  { %590 = shalt.err (!%p587_p10)
}
  0x19   :  { %s591_s24 = scalar_lea.vmem %s676_s27, 1024  ;;  %p596_p12 = scmp.lt.s32.totalorder %s676_s27, %s676_s27 }
  0x1a   :  { %p592_p11 = scmp.ne.s32.totalorder %s676_s27, %s591_s24  ;;  %p597_p13 = scmp.lt.s32.totalorder %s591_s24, %s591_s24 }
  0x1c   :  { %p598_p0 = por %p597_p13, %p596_p12 }
  0x1e   :  { %p599_p1 = pnand %p598_p0, %p592_p11 }
  0x20   :  { %602 = shalt.err (!%p599_p1)
}
  0x21   :  { %27 = dma.hbm_to_vmem [thread:$0]  %s774_s1, 1024, %s676_s27, [#allocation3], %s631_s13, %s631_s13, %s632_s14  }
  0x22   :  { %s633_s26 = smov [#allocation6]   ;;  %s603_s8 = scalar_lea.hbm %s778_s5, 1024 }
  0x23   :  { %s49_s28 = sshll.u32 %s633_s26, 4  ;;  %p604_p2 = scmp.ne.s32.totalorder %s778_s5, %s603_s8  ;;  %s50_s28 = int_to_ptr.vmem [resolvable:$true] %s49_s28 }
  0x24   :  { %p607_p3 = scmp.lt.u32.totalorder %s603_s8, %s778_s5 }
  0x26   :  { %p609_p4 = pnand %p607_p3, %p604_p2 }
  0x28   :  { %612 = shalt.err (!%p609_p4)
}
  0x29   :  { %s613_s15 = scalar_lea.vmem %s50_s28, 1024  ;;  %p618_p6 = scmp.lt.s32.totalorder %s50_s28, %s50_s28 }
  0x2a   :  { %p614_p5 = scmp.ne.s32.totalorder %s50_s28, %s613_s15  ;;  %p619_p7 = scmp.lt.s32.totalorder %s613_s15, %s613_s15 }
  0x2c   :  { %p620_p8 = por %p619_p7, %p618_p6 }
  0x2e   :  { %p621_p9 = pnand %p620_p8, %p614_p5 }
  0x30   :  { %624 = shalt.err (!%p621_p9)
}
  0x31   :  { %55 = dma.hbm_to_vmem [thread:$0]  %s778_s5, 1024, %s50_s28, [#allocation5], %s631_s13, %s631_s13, %s632_s14  }
  0x32   :  { %625 = dma.done.wait [#allocation3], 1024  }
  0x33   :  { %626 = vsyncadd [#allocation3], 4294966272 }
  0x34   :  { %627 = dma.done.wait [#allocation5], 2048  }
  0x35   :  { %628 = vsyncadd [#allocation5], 4294965248  ;;  %v634_v0 = vmov 0.0   ;;  %vm635_vm0 = vmmov 0   ;;  %v535_v1 = vld [vmem:[#allocation2] sm:$0xff]   ;;  %v536_v2 = vld [vmem:[#allocation2 + $0x8] sm:$0xff]  }
  0x36   :  { %468 = vmatprep.subr.bf16.mxu0 %v634_v0  ;;  %484 = vmatprep.mubr.msk.bf16.mxu0 %vm635_vm0, %v634_v0  ;;  %v537_v3 = vld [vmem:[#allocation2 + $0x10] sm:$0xff]   ;;  %v543_v4 = vld [vmem:[#allocation4] sm:$0xff]   ;;  %v538_v5 = vld [vmem:[#allocation2 + $0x18] sm:$0xff]  }
  0x37   :  { %488 = vmatprep.subr.bf16.mxu1 %v634_v0  ;;  %504 = vmatprep.mubr.msk.bf16.mxu1 %vm635_vm0, %v634_v0  ;;  %v544_v6 = vld [vmem:[#allocation4 + $0x8] sm:$0xff]   ;;  %v539_v7 = vld [vmem:[#allocation2 + $0x20] sm:$0xff]   ;;  %v545_v8 = vld [vmem:[#allocation4 + $0x10] sm:$0xff]  }
  0x38   :  { %469 = vmatpush3.bf16.msra.mxu0 %v535_v1  ;;  %489 = vmatpush3.bf16.msra.mxu1 %v543_v4  ;;  %v540_v9 = vld [vmem:[#allocation2 + $0x28] sm:$0xff]   ;;  %v546_v10 = vld [vmem:[#allocation4 + $0x18] sm:$0xff]   ;;  %v541_v11 = vld [vmem:[#allocation2 + $0x30] sm:$0xff]  }
  0x39   :  { %470 = vmatprep.subr.bf16.mxu0 %v634_v0  ;;  %490 = vmatprep.subr.bf16.mxu1 %v634_v0  ;;  %v547_v12 = vld [vmem:[#allocation4 + $0x20] sm:$0xff]   ;;  %v542_v13 = vld [vmem:[#allocation2 + $0x38] sm:$0xff]   ;;  %v548_v15 = vld [vmem:[#allocation4 + $0x28] sm:$0xff]  }
  0x3a   :  { %v68_v14 = vld [vmem:[%s773_s0] sm:$0xff]  ;;  %v549_v17 = vld [vmem:[#allocation4 + $0x30] sm:$0xff]   ;;  %v550_v18 = vld [vmem:[#allocation4 + $0x38] sm:$0xff]  }
  0x3b   :  { %v69_v16 = vpack.c.bf16 %v68_v14, %v68_v14  ;;  %v551_v19 = vld [vmem:[#allocation6] sm:$0xff]   ;;  %v552_v20 = vld [vmem:[#allocation6 + $0x8] sm:$0xff]   ;;  %v553_v21 = vld [vmem:[#allocation6 + $0x10] sm:$0xff]  }
  0x3c   :  { %471 = vmatpush3.bf16.msra.mxu0 %v536_v2  ;;  %491 = vmatpush3.bf16.msra.mxu1 %v544_v6  ;;  %v554_v22 = vld [vmem:[#allocation6 + $0x18] sm:$0xff]   ;;  %v555_v23 = vld [vmem:[#allocation6 + $0x20] sm:$0xff]   ;;  %v556_v24 = vld [vmem:[#allocation6 + $0x28] sm:$0xff]  }
  0x3d   :  { %472 = vmatprep.subr.bf16.mxu0 %v634_v0  ;;  %492 = vmatprep.subr.bf16.mxu1 %v634_v0  ;;  %v414_v25 = vld [vmem:[%s775_s2] ss:$0 sm:$0xff]  ;;  %v557_v33 = vld [vmem:[#allocation6 + $0x30] sm:$0xff]   ;;  %v558_v34 = vld [vmem:[#allocation6 + $0x38] sm:$0xff]  }
  0x3e   :  { %v423_v35 = vld [vmem:[%s777_s4] ss:$0 sm:$0xff] }
  0x3f   :  { %v432_v43 = vld [vmem:[%s779_s6] ss:$0 sm:$0xff] }
  0x40   :  { %473 = vmatpush3.bf16.msra.mxu0 %v537_v3  ;;  %493 = vmatpush3.bf16.msra.mxu1 %v545_v8 }
  0x41   :  { %474 = vmatprep.subr.bf16.mxu0 %v634_v0  ;;  %494 = vmatprep.subr.bf16.mxu1 %v634_v0 }
  0x44   :  { %475 = vmatpush3.bf16.msra.mxu0 %v538_v5  ;;  %495 = vmatpush3.bf16.msra.mxu1 %v546_v10 }
  0x45   :  { %476 = vmatprep.subr.bf16.mxu0 %v634_v0  ;;  %496 = vmatprep.subr.bf16.mxu1 %v634_v0 }
  0x48   :  { %477 = vmatpush3.bf16.msra.mxu0 %v539_v7  ;;  %497 = vmatpush3.bf16.msra.mxu1 %v547_v12 }
  0x49   :  { %478 = vmatprep.subr.bf16.mxu0 %v634_v0  ;;  %498 = vmatprep.subr.bf16.mxu1 %v634_v0 }
  0x4c   :  { %479 = vmatpush3.bf16.msra.mxu0 %v540_v9  ;;  %499 = vmatpush3.bf16.msra.mxu1 %v548_v15 }
  0x4d   :  { %480 = vmatprep.subr.bf16.mxu0 %v634_v0  ;;  %500 = vmatprep.subr.bf16.mxu1 %v634_v0 }
  0x50   :  { %481 = vmatpush3.bf16.msra.mxu0 %v541_v11  ;;  %501 = vmatpush3.bf16.msra.mxu1 %v549_v17 }
  0x51   :  { %482 = vmatprep.subr.bf16.mxu0 %v634_v0  ;;  %502 = vmatprep.subr.bf16.mxu1 %v634_v0 }
  0x54   :  { %483 = vmatpush3.bf16.msra.mxu0 %v542_v13  ;;  %503 = vmatpush3.bf16.msra.mxu1 %v550_v18 }
  0x55   :  { %508 = vmatprep.subr.bf16.mxu0 %v634_v0 }
  0x57   :  { %485 = vmatmul.mubr.bf16.vlgmr.msra.gmra.mrb[0].mxu0 %v69_v16 }
  0x58   :  { %524 = vmatprep.mubr.msk.bf16.mxu0 %vm635_vm0, %v634_v0  ;;  %509 = vmatpush3.bf16.msra.mxu0 %v551_v19 }
  0x59   :  { %510 = vmatprep.subr.bf16.mxu0 %v634_v0 }
  0x5c   :  { %511 = vmatpush3.bf16.msra.mxu0 %v552_v20 }
  0x5d   :  { %512 = vmatprep.subr.bf16.mxu0 %v634_v0 }
  0x60   :  { %513 = vmatpush3.bf16.msra.mxu0 %v553_v21 }
  0x61   :  { %514 = vmatprep.subr.bf16.mxu0 %v634_v0 }
  0x64   :  { %515 = vmatpush3.bf16.msra.mxu0 %v554_v22 }
  0x65   :  { %516 = vmatprep.subr.bf16.mxu0 %v634_v0 }
  0x68   :  { %517 = vmatpush3.bf16.msra.mxu0 %v555_v23 }
  0x69   :  { %518 = vmatprep.subr.bf16.mxu0 %v634_v0 }
  0x6c   :  { %519 = vmatpush3.bf16.msra.mxu0 %v556_v24 }
  0x6d   :  { %520 = vmatprep.subr.bf16.mxu0 %v634_v0 }
  0x70   :  { %521 = vmatpush3.bf16.msra.mxu0 %v557_v33 }
  0x71   :  { %522 = vmatprep.subr.bf16.mxu0 %v634_v0 }
  0x74   :  { %523 = vmatpush3.bf16.msra.mxu0 %v558_v34 }
 0x12a   :  { %v175_v26 = vpop.f32.mrb[0].mxu0 }
 0x12b   :  { %v176_v27 = vadd.f32 %v414_v25, %v175_v26  ;;  %v486_v28 = vpop.f32.mrb[1].mxu0 }
 0x12c   :  { %v178_v29 = vpop.f32.mrb[2].mxu0 }
 0x12d   :  { %v181_v30 = vmax.f32 %v176_v27, 0.0  ;;  %v487_v31 = vpop.f32.mrb[3].mxu0 }
 0x12f   :  { %v182_v32 = vpack.c.bf16 %v181_v30, %v181_v30 }
 0x131   :  { %505 = vmatmul.mubr.bf16.vlgmr.msra.gmra.mrb[0].mxu1 %v182_v32 }
 0x204   :  { %v288_v36 = vpop.f32.mrb[0].mxu1 }
 0x205   :  { %v289_v37 = vadd.f32 %v423_v35, %v288_v36  ;;  %v506_v38 = vpop.f32.mrb[1].mxu1 }
 0x206   :  { %v291_v39 = vpop.f32.mrb[2].mxu1 }
 0x207   :  { %v294_v40 = vmax.f32 %v289_v37, 0.0  ;;  %v507_v41 = vpop.f32.mrb[3].mxu1 }
 0x209   :  { %v295_v42 = vpack.c.bf16 %v294_v40, %v294_v40 }
 0x20b   :  { %525 = vmatmul.mubr.bf16.vlgmr.msra.gmra.mrb[4].mxu0 %v295_v42 }
 0x2de   :  { %v401_v44 = vpop.f32.mrb[4].mxu0 }
 0x2df   :  { %v402_v45 = vadd.f32 %v432_v43, %v401_v44  ;;  %v526_v46 = vpop.f32.mrb[5].mxu0 }
 0x2e0   :  { %v404_v47 = vpop.f32.mrb[6].mxu0 }
 0x2e1   :  { %407 = vst [vmem:[%s780_s7] sm:$0xff] %v402_v45  ;;  %v527_v48 = vpop.f32.mrb[7].mxu0 }
 0x2e2   :  { %412 = vsyncpa [#allocation3], 1 }
 0x2e3   :  { %413 = vsyncpa [#allocation5], 1 }

</bundles_post_ra>
